<compile_context>
chip_gen: v5e
topology: v5e:2x2
jax: 0.10.0
libtpu: 0.0.40
codegen_flags: <defaults>
</compile_context>

<pallas_src>
import functools

import jax
import jax.numpy as jnp
from jax.experimental import pallas as pl
from jax.experimental.pallas import tpu as pltpu

BN_EPS = 1e-5


def _round_up(x, m):
    return ((x + m - 1) // m) * m


def _asph_mlp_kernel(x_ref, w1_ref, w2_ref, w3_ref, bn_ref, o_ref,
                     *, matmul_dtype, real_batch):
    """3 x [Linear (bias cancelled by train-mode BN) + BN + ReLU], VMEM-resident."""
    pad_batch = x_ref.shape[0]
    inv_batch = 1.0 / real_batch
    need_mask = pad_batch != real_batch
    if need_mask:
        row_idx = jax.lax.broadcasted_iota(jnp.int32, (pad_batch, 1), 0)
        valid = row_idx < real_batch
    else:
        valid = None

    def layer(h, w_ref, layer_idx):
        d_out = w_ref.shape[1]
        # Linear on the MXU, f32 accumulation.
        y = jnp.dot(h, w_ref[...], preferred_element_type=jnp.float32)
        # Batch statistics over the *real* rows only (centered, two-pass variance).
        ym = jnp.where(valid, y, 0.0) if need_mask else y
        mean = jnp.sum(ym, axis=0, keepdims=True) * inv_batch
        centered = y - mean
        cm = jnp.where(valid, centered, 0.0) if need_mask else centered
        var = jnp.sum(cm * cm, axis=0, keepdims=True) * inv_batch
        # gamma/beta packed in one slab: rows (2i, 2i+1), first d_out lanes.
        gb = bn_ref[2 * layer_idx:2 * layer_idx + 2, 0:d_out]
        scale = gb[0:1, :] * jax.lax.rsqrt(var + BN_EPS)
        return jnp.maximum(centered * scale + gb[1:2, :], 0.0)

    h = layer(x_ref[...].astype(matmul_dtype), w1_ref, 0)   # cast x in-kernel
    h = layer(h.astype(matmul_dtype), w2_ref, 1)
    h = layer(h.astype(matmul_dtype), w3_ref, 2)
    o_ref[...] = h.astype(o_ref.dtype)


def prepare_asph_params(params, out_dim, matmul_dtype=jnp.bfloat16):
    """One-time parameter prep (outside the jitted forward):
       * weights pre-transposed (in, out) and cast to the matmul dtype,
       * last layer padded to a lane-dense multiple of 128,
       * all six gamma/beta vectors packed into one (6, 512) f32 slab.
    Linear biases are intentionally dropped (cancelled by training-mode BN)."""
    w1, _b1, g1, be1, w2, _b2, g2, be2, w3, _b3, g3, be3 = params

    pad_out = _round_up(max(out_dim, 128), 128)
    if pad_out != out_dim:
        extra = pad_out - out_dim
        w3 = jnp.pad(w3, ((0, 0), (0, extra)))
        g3 = jnp.pad(g3, ((0, 0), (0, extra)), constant_values=1.0)
        be3 = jnp.pad(be3, ((0, 0), (0, extra)))

    slab_w = max(w1.shape[1], w2.shape[1], pad_out)

    def row(v):
        return jnp.pad(v, ((0, 0), (0, slab_w - v.shape[1])))

    bn_slab = jnp.concatenate(
        [row(g1), row(be1), row(g2), row(be2), row(g3), row(be3)],
        axis=0).astype(jnp.float32)

    return (w1.astype(matmul_dtype),
            w2.astype(matmul_dtype),
            w3.astype(matmul_dtype),
            bn_slab)


@functools.partial(jax.jit, static_argnames=("out_dim", "matmul_dtype"))
def asph_encoder_forward(x, prepared, out_dim=64, matmul_dtype=jnp.bfloat16):
    """x: (batch, input_dim) f32.  prepared = prepare_asph_params(...)."""
    w1_m, w2_m, w3_m, bn_slab = prepared
    batch = x.shape[0]
    pad_out = w3_m.shape[1]

    # Pad batch so activations fill whole vregs (16 sublanes for bf16, 8 for f32).
    sub = 8 * (4 // jnp.dtype(matmul_dtype).itemsize)
    pad_batch = _round_up(max(batch, sub), sub)
    if pad_batch != batch:
        x = jnp.pad(x, ((0, pad_batch - batch), (0, 0)))

    kernel = functools.partial(_asph_mlp_kernel,
                               matmul_dtype=matmul_dtype,
                               real_batch=batch)

    vmem = pl.BlockSpec(memory_space=pltpu.MemorySpace.VMEM)
    out_padded = pl.pallas_call(
        kernel,
        out_shape=jax.ShapeDtypeStruct((pad_batch, pad_out), jnp.float32),
        in_specs=[vmem] * 5,
        out_specs=vmem,
    )(x, w1_m, w2_m, w3_m, bn_slab)

    # TODO(synk): for large batches, return the padded buffer and fold this slice
    # into the consumer's first op instead of paying a separate copy here.
    return out_padded[:batch, :out_dim]


def init_asph_params(key, input_dim, out_dim):
    """PyTorch-default init: Linear U(-1/sqrt(fan_in), ...) weight+bias,
    BatchNorm1d weight=1 bias=0.  Weights stored pre-transposed (in, out)."""
    dims = [(input_dim, 512), (512, 128), (128, out_dim)]
    params = []
    for d_in, d_out in dims:
        key, kw, kb = jax.random.split(key, 3)
        bound = 1.0 / jnp.sqrt(d_in)
        w = jax.random.uniform(kw, (d_in, d_out), jnp.float32, -bound, bound)
        b = jax.random.uniform(kb, (1, d_out), jnp.float32, -bound, bound)
        params += [w, b, jnp.ones((1, d_out), jnp.float32),
                   jnp.zeros((1, d_out), jnp.float32)]
    return tuple(params)


def asph_reference(x, params, matmul_dtype=jnp.float32):
    """Pure-JAX reference of the PyTorch forward (training-mode BN, bias INCLUDED
    — validates that the kernel's bias cancellation is exact)."""
    h = x.astype(jnp.float32)
    for i in range(3):
        w, b, g, be = params[4 * i: 4 * i + 4]
        y = jnp.dot(h.astype(matmul_dtype), w.astype(matmul_dtype),
                    preferred_element_type=jnp.float32) + b
        mean = jnp.mean(y, axis=0, keepdims=True)
        var = jnp.mean(jnp.square(y - mean), axis=0, keepdims=True)
        h = jnp.maximum((y - mean) * jax.lax.rsqrt(var + BN_EPS) * g + be, 0.0)
    return h


if __name__ == "__main__":
    # Small, tile-friendly shapes consistent with ASPHEncoder(input_dim, 1024, out_dim).
    batch, input_dim, out_dim = 16, 256, 64

    key = jax.random.PRNGKey(0)
    key, kx = jax.random.split(key)
    x = jax.random.normal(kx, (batch, input_dim), jnp.float32)
    params = init_asph_params(key, input_dim, out_dim)

    # Default path: bf16 MXU inputs on every generation; params prepared once.
    prepared_bf16 = prepare_asph_params(params, out_dim)                 # bf16 default
    out = jax.block_until_ready(asph_encoder_forward(x, prepared_bf16, out_dim=out_dim))
    ref_bf16 = asph_reference(x, params, matmul_dtype=jnp.bfloat16)
    assert out.shape == (batch, out_dim), out.shape
    assert jnp.allclose(out, ref_bf16, atol=5e-2, rtol=5e-2), \
        float(jnp.max(jnp.abs(out - ref_bf16)))

    # Strict f32 MXU check: exact bias cancellation + folded/centered BN numerics.
    prepared_f32 = prepare_asph_params(params, out_dim, matmul_dtype=jnp.float32)
    out32 = jax.block_until_ready(
        asph_encoder_forward(x, prepared_f32, out_dim=out_dim, matmul_dtype=jnp.float32))
    ref32 = asph_reference(x, params)
    assert jnp.allclose(out32, ref32, atol=1e-4, rtol=1e-4), \
        float(jnp.max(jnp.abs(out32 - ref32)))

    # Ragged batch: exercises batch padding + masked BN statistics in the kernel.
    xr = x[:10]
    outr = jax.block_until_ready(asph_encoder_forward(xr, prepared_bf16, out_dim=out_dim))
    refr = asph_reference(xr, params, matmul_dtype=jnp.bfloat16)
    assert outr.shape == (10, out_dim), outr.shape
    assert jnp.allclose(outr, refr, atol=5e-2, rtol=5e-2), \
        float(jnp.max(jnp.abs(outr - refr)))

    print("KERNEL_OK")
</pallas_src>

<mosaic_0001>
module attributes {stable_mosaic.version = 11 : i64} {
  func.func @_asph_mlp_kernel(%arg0: memref<16x256xf32, #tpu.memory_space<vmem>>, %arg1: memref<256x512xbf16, #tpu.memory_space<vmem>>, %arg2: memref<512x128xbf16, #tpu.memory_space<vmem>>, %arg3: memref<128x128xbf16, #tpu.memory_space<vmem>>, %arg4: memref<6x512xf32, #tpu.memory_space<vmem>>, %arg5: memref<16x128xf32, #tpu.memory_space<vmem>>) attributes {dimension_semantics = [], scalar_prefetch = 0 : i64, scratch_operands = 0 : i64, tpu.core_type = #tpu.core_type<tc>} {
    %c0 = arith.constant 0 : index
    %c0_0 = arith.constant 0 : index
    %0 = vector.load %arg0[%c0, %c0_0] : memref<16x256xf32, #tpu.memory_space<vmem>>, vector<16x256xf32>
    %1 = arith.truncf %0 : vector<16x256xf32> to vector<16x256xbf16>
    %c0_1 = arith.constant 0 : index
    %c0_2 = arith.constant 0 : index
    %2 = vector.load %arg1[%c0_1, %c0_2] : memref<256x512xbf16, #tpu.memory_space<vmem>>, vector<256x512xbf16>
    %cst = arith.constant dense<0.000000e+00> : vector<16x512xf32>
    %3 = tpu.matmul %1, %2, %cst {dimension_numbers = #tpu.dot_dimension_numbers<[1], [0], [0], [1], [0, 0, 1, 1], [], []>} : vector<16x256xbf16>, vector<256x512xbf16>, vector<16x512xf32> -> vector<16x512xf32>
    %cst_3 = arith.constant dense<0.000000e+00> : vector<512xf32>
    %4 = vector.multi_reduction <add>, %3, %cst_3 [0] : vector<16x512xf32> to vector<512xf32>
    %5 = vector.shape_cast %4 : vector<512xf32> to vector<1x512xf32>
    %cst_4 = arith.constant 6.250000e-02 : f32
    %6 = vector.broadcast %cst_4 : f32 to vector<1x512xf32>
    %7 = arith.mulf %5, %6 : vector<1x512xf32>
    %8 = vector.broadcast %7 : vector<1x512xf32> to vector<16x512xf32>
    %9 = arith.subf %3, %8 : vector<16x512xf32>
    %10 = arith.mulf %9, %9 : vector<16x512xf32>
    %cst_5 = arith.constant dense<0.000000e+00> : vector<512xf32>
    %11 = vector.multi_reduction <add>, %10, %cst_5 [0] : vector<16x512xf32> to vector<512xf32>
    %12 = vector.shape_cast %11 : vector<512xf32> to vector<1x512xf32>
    %cst_6 = arith.constant 6.250000e-02 : f32
    %13 = vector.broadcast %cst_6 : f32 to vector<1x512xf32>
    %14 = arith.mulf %12, %13 : vector<1x512xf32>
    %c0_7 = arith.constant 0 : index
    %c0_8 = arith.constant 0 : index
    %15 = vector.load %arg4[%c0_7, %c0_8] : memref<6x512xf32, #tpu.memory_space<vmem>>, vector<2x512xf32>
    %16 = vector.extract_strided_slice %15 {offsets = [0, 0], sizes = [1, 512], strides = [1, 1]} : vector<2x512xf32> to vector<1x512xf32>
    %cst_9 = arith.constant 9.99999974E-6 : f32
    %17 = vector.broadcast %cst_9 : f32 to vector<1x512xf32>
    %18 = arith.addf %14, %17 : vector<1x512xf32>
    %19 = math.rsqrt %18 : vector<1x512xf32>
    %20 = arith.mulf %16, %19 : vector<1x512xf32>
    %21 = vector.broadcast %20 : vector<1x512xf32> to vector<16x512xf32>
    %22 = arith.mulf %9, %21 : vector<16x512xf32>
    %23 = vector.extract_strided_slice %15 {offsets = [1, 0], sizes = [1, 512], strides = [1, 1]} : vector<2x512xf32> to vector<1x512xf32>
    %24 = vector.broadcast %23 : vector<1x512xf32> to vector<16x512xf32>
    %25 = arith.addf %22, %24 : vector<16x512xf32>
    %cst_10 = arith.constant 0.000000e+00 : f32
    %26 = vector.broadcast %cst_10 : f32 to vector<16x512xf32>
    %27 = arith.maximumf %25, %26 : vector<16x512xf32>
    %28 = arith.truncf %27 : vector<16x512xf32> to vector<16x512xbf16>
    %c0_11 = arith.constant 0 : index
    %c0_12 = arith.constant 0 : index
    %29 = vector.load %arg2[%c0_11, %c0_12] : memref<512x128xbf16, #tpu.memory_space<vmem>>, vector<512x128xbf16>
    %cst_13 = arith.constant dense<0.000000e+00> : vector<16x128xf32>
    %30 = tpu.matmul %28, %29, %cst_13 {dimension_numbers = #tpu.dot_dimension_numbers<[1], [0], [0], [1], [0, 0, 1, 1], [], []>} : vector<16x512xbf16>, vector<512x128xbf16>, vector<16x128xf32> -> vector<16x128xf32>
    %cst_14 = arith.constant dense<0.000000e+00> : vector<128xf32>
    %31 = vector.multi_reduction <add>, %30, %cst_14 [0] : vector<16x128xf32> to vector<128xf32>
    %32 = vector.shape_cast %31 : vector<128xf32> to vector<1x128xf32>
    %cst_15 = arith.constant 6.250000e-02 : f32
    %33 = vector.broadcast %cst_15 : f32 to vector<1x128xf32>
    %34 = arith.mulf %32, %33 : vector<1x128xf32>
    %35 = vector.broadcast %34 : vector<1x128xf32> to vector<16x128xf32>
    %36 = arith.subf %30, %35 : vector<16x128xf32>
    %37 = arith.mulf %36, %36 : vector<16x128xf32>
    %cst_16 = arith.constant dense<0.000000e+00> : vector<128xf32>
    %38 = vector.multi_reduction <add>, %37, %cst_16 [0] : vector<16x128xf32> to vector<128xf32>
    %39 = vector.shape_cast %38 : vector<128xf32> to vector<1x128xf32>
    %cst_17 = arith.constant 6.250000e-02 : f32
    %40 = vector.broadcast %cst_17 : f32 to vector<1x128xf32>
    %41 = arith.mulf %39, %40 : vector<1x128xf32>
    %c2 = arith.constant 2 : index
    %c0_18 = arith.constant 0 : index
    %42 = vector.load %arg4[%c2, %c0_18] : memref<6x512xf32, #tpu.memory_space<vmem>>, vector<2x128xf32>
    %43 = vector.extract_strided_slice %42 {offsets = [0, 0], sizes = [1, 128], strides = [1, 1]} : vector<2x128xf32> to vector<1x128xf32>
    %cst_19 = arith.constant 9.99999974E-6 : f32
    %44 = vector.broadcast %cst_19 : f32 to vector<1x128xf32>
    %45 = arith.addf %41, %44 : vector<1x128xf32>
    %46 = math.rsqrt %45 : vector<1x128xf32>
    %47 = arith.mulf %43, %46 : vector<1x128xf32>
    %48 = vector.broadcast %47 : vector<1x128xf32> to vector<16x128xf32>
    %49 = arith.mulf %36, %48 : vector<16x128xf32>
    %50 = vector.extract_strided_slice %42 {offsets = [1, 0], sizes = [1, 128], strides = [1, 1]} : vector<2x128xf32> to vector<1x128xf32>
    %51 = vector.broadcast %50 : vector<1x128xf32> to vector<16x128xf32>
    %52 = arith.addf %49, %51 : vector<16x128xf32>
    %cst_20 = arith.constant 0.000000e+00 : f32
    %53 = vector.broadcast %cst_20 : f32 to vector<16x128xf32>
    %54 = arith.maximumf %52, %53 : vector<16x128xf32>
    %55 = arith.truncf %54 : vector<16x128xf32> to vector<16x128xbf16>
    %c0_21 = arith.constant 0 : index
    %c0_22 = arith.constant 0 : index
    %56 = vector.load %arg3[%c0_21, %c0_22] : memref<128x128xbf16, #tpu.memory_space<vmem>>, vector<128x128xbf16>
    %cst_23 = arith.constant dense<0.000000e+00> : vector<16x128xf32>
    %57 = tpu.matmul %55, %56, %cst_23 {dimension_numbers = #tpu.dot_dimension_numbers<[1], [0], [0], [1], [0, 0, 1, 1], [], []>} : vector<16x128xbf16>, vector<128x128xbf16>, vector<16x128xf32> -> vector<16x128xf32>
    %cst_24 = arith.constant dense<0.000000e+00> : vector<128xf32>
    %58 = vector.multi_reduction <add>, %57, %cst_24 [0] : vector<16x128xf32> to vector<128xf32>
    %59 = vector.shape_cast %58 : vector<128xf32> to vector<1x128xf32>
    %cst_25 = arith.constant 6.250000e-02 : f32
    %60 = vector.broadcast %cst_25 : f32 to vector<1x128xf32>
    %61 = arith.mulf %59, %60 : vector<1x128xf32>
    %62 = vector.broadcast %61 : vector<1x128xf32> to vector<16x128xf32>
    %63 = arith.subf %57, %62 : vector<16x128xf32>
    %64 = arith.mulf %63, %63 : vector<16x128xf32>
    %cst_26 = arith.constant dense<0.000000e+00> : vector<128xf32>
    %65 = vector.multi_reduction <add>, %64, %cst_26 [0] : vector<16x128xf32> to vector<128xf32>
    %66 = vector.shape_cast %65 : vector<128xf32> to vector<1x128xf32>
    %cst_27 = arith.constant 6.250000e-02 : f32
    %67 = vector.broadcast %cst_27 : f32 to vector<1x128xf32>
    %68 = arith.mulf %66, %67 : vector<1x128xf32>
    %c4 = arith.constant 4 : index
    %c0_28 = arith.constant 0 : index
    %69 = vector.load %arg4[%c4, %c0_28] : memref<6x512xf32, #tpu.memory_space<vmem>>, vector<2x128xf32>
    %70 = vector.extract_strided_slice %69 {offsets = [0, 0], sizes = [1, 128], strides = [1, 1]} : vector<2x128xf32> to vector<1x128xf32>
    %cst_29 = arith.constant 9.99999974E-6 : f32
    %71 = vector.broadcast %cst_29 : f32 to vector<1x128xf32>
    %72 = arith.addf %68, %71 : vector<1x128xf32>
    %73 = math.rsqrt %72 : vector<1x128xf32>
    %74 = arith.mulf %70, %73 : vector<1x128xf32>
    %75 = vector.broadcast %74 : vector<1x128xf32> to vector<16x128xf32>
    %76 = arith.mulf %63, %75 : vector<16x128xf32>
    %77 = vector.extract_strided_slice %69 {offsets = [1, 0], sizes = [1, 128], strides = [1, 1]} : vector<2x128xf32> to vector<1x128xf32>
    %78 = vector.broadcast %77 : vector<1x128xf32> to vector<16x128xf32>
    %79 = arith.addf %76, %78 : vector<16x128xf32>
    %cst_30 = arith.constant 0.000000e+00 : f32
    %80 = vector.broadcast %cst_30 : f32 to vector<16x128xf32>
    %81 = arith.maximumf %79, %80 : vector<16x128xf32>
    %c0_31 = arith.constant 0 : index
    %c0_32 = arith.constant 0 : index
    %82 = vector.load %arg5[%c0_31, %c0_32] : memref<16x128xf32, #tpu.memory_space<vmem>>, vector<16x128xf32>
    tpu.vector_store %arg5[%c0_31, %c0_32], %81 {strides = array<i32>} : memref<16x128xf32, #tpu.memory_space<vmem>>, vector<16x128xf32>,
    return
  }
}

</mosaic_0001>

<bundles_post_ra>
// kernel: asph_encoder_forward.1
= control target key start
LH: loop header
LB: loop body
LE: loop exit
PB: predicated region body
PF: predicated region fallthrough
CT: control target
= control target key end

     0   :  { %10 = vsyncpa [#allocation3], 0  ;;  %s2076_s0 = inlined_call_operand.hbm [shape: f32[16,256], index: 0, kind: input, shape index: {}]   ;;  %s2077_s1 = inlined_call_operand.hbm [shape: bf16[256,512], index: 1, kind: input, shape index: {}]   ;;  %s2078_s2 = inlined_call_operand.hbm [shape: bf16[512,128], index: 2, kind: input, shape index: {}]   ;;  %s2079_s3 = inlined_call_operand.hbm [shape: bf16[128,128], index: 3, kind: input, shape index: {}]   ;;  %s2080_s4 = inlined_call_operand.hbm [shape: f32[6,512], index: 4, kind: input, shape index: {}]   ;;  %s2081_s5 = inlined_call_operand.hbm [shape: f32[16,128], index: 5, kind: output, shape index: {}]  }
   0x1   :  { %11 = vsyncpa [#allocation6], 0 }
   0x2   :  { %12 = vsyncpa [#allocation9], 0 }
   0x3   :  { %13 = vsyncpa [#allocation4], 0  ;;  %s31_s20 = sshll.u32 %s2077_s1, 4  ;;  %s1959_s21 = smov [#allocation5]   ;;  %s32_s20 = int_to_ptr.hbm [resolvable:$true] %s31_s20 }
   0x4   :  { %s33_s22 = sshll.u32 %s1959_s21, 4  ;;  %s1960_s23 = smov 256   ;;  %s34_s22 = int_to_ptr.vmem [resolvable:$true] %s33_s22 }
   0x5   :  { %s1961_s24 = smov 16   ;;  %s57_s27 = sshll.u32 %s2079_s3, 4  ;;  %s58_s27 = int_to_ptr.hbm [resolvable:$true] %s57_s27 }
   0x6   :  { %39 = dma.hbm_to_vmem [thread:$0]  %s32_s20, 8192, %s34_s22, [#allocation6], %s1960_s23, %s1960_s23, %s1961_s24  }
   0x7   :  { %s1962_s28 = smov [#allocation8]   ;;  %s18_s7 = sshll.u32 %s2076_s0, 4  ;;  %s19_s7 = int_to_ptr.hbm [resolvable:$true] %s18_s7 }
   0x8   :  { %s59_s29 = sshll.u32 %s1962_s28, 4  ;;  %s1963_s1 = smov 64   ;;  %s60_s29 = int_to_ptr.vmem [resolvable:$true] %s59_s29 }
   0x9   :  { %s1964_s8 = smov 4   ;;  %s44_s11 = sshll.u32 %s2078_s2, 4  ;;  %s45_s11 = int_to_ptr.hbm [resolvable:$true] %s44_s11 }
   0xa   :  { %65 = dma.hbm_to_vmem [thread:$0]  %s58_s27, 1024, %s60_s29, [#allocation9], %s1963_s1, %s1963_s1, %s1964_s8  }
   0xb   :  { %s1965_s12 = smov [#allocation2]   ;;  %s1966_s3 = smov [#allocation7]  }
   0xc   :  { %s20_s13 = sshll.u32 %s1965_s12, 4  ;;  %s46_s14 = sshll.u32 %s1966_s3, 4  ;;  %s21_s13 = int_to_ptr.vmem [resolvable:$true] %s20_s13  ;;  %s47_s14 = int_to_ptr.vmem [resolvable:$true] %s46_s14 }
   0xd   :  { %26 = dma.hbm_to_vmem [thread:$0]  %s19_s7, 512, %s21_s13, [#allocation3], %s1960_s23, %s1960_s23, %s1961_s24  }
   0xe   :  { %s71_s0 = sshll.u32 %s2080_s4, 4  ;;  %s1967_s17 = smov [#allocation10]   ;;  %s72_s0 = int_to_ptr.hbm [resolvable:$true] %s71_s0 }
   0xf   :  { %52 = dma.hbm_to_vmem [thread:$0]  %s45_s11, 4096, %s47_s14, [#allocation6], %s1963_s1, %s1963_s1, %s1964_s8  }
  0x10   :  { %s73_s18 = sshll.u32 %s1967_s17, 4  ;;  %s74_s18 = int_to_ptr.vmem [resolvable:$true] %s73_s18 }
  0x11   :  { %76 = dma.hbm_to_vmem [thread:$0]  %s72_s0, 512, %s74_s18, [#allocation9]  }
  0x12   :  { %1951 = dma.done.wait [#allocation3], 512  }
  0x13   :  { %1952 = vsyncadd [#allocation3], 4294966784 }
  0x14   :  { %1953 = dma.done.wait [#allocation6], 12288  }
  0x15   :  { %1954 = vsyncadd [#allocation6], 4294955008 }
  0x16   :  { %1955 = dma.done.wait [#allocation9], 1536  }
  0x17   :  { %1956 = vsyncadd [#allocation9], 4294965760  ;;  %v1377_v0 = vld [vmem:[#allocation5 + $0xe0] sm:$0xf]  ;;  %v1709_v1 = vld [vmem:[#allocation5 + $0xec] sm:$0xf0] }
  0x18   :  { %v1505_v2 = vld [vmem:[#allocation5 + $0x1e0] sm:$0xf]  ;;  %v1378_v3 = vor.u32 %v1709_v1, %v1377_v0  ;;  %v1741_v4 = vld [vmem:[#allocation5 + $0x1ec] sm:$0xf0]  ;;  %v1707_v5 = vld [vmem:[#allocation5 + $0xe4] sm:$0xf] }
  0x19   :  { %v1379_v6 = vld [vmem:[#allocation5 + $0xf0] sm:$0xf0]  ;;  %v1506_v7 = vor.u32 %v1741_v4, %v1505_v2  ;;  %v1739_v9 = vld [vmem:[#allocation5 + $0x1e4] sm:$0xf]  ;;  %v1361_v11 = vld [vmem:[#allocation5 + $0xc0] sm:$0xf] }
  0x1a   :  { %v1382_v8 = vor.u32 %v1707_v5, %v1379_v6  ;;  %v1507_v10 = vld [vmem:[#allocation5 + $0x1f0] sm:$0xf0]  ;;  %487 = vmatpush.bf16.msra.mxu0 %v1378_v3  ;;  %v1705_v13 = vld [vmem:[#allocation5 + $0xcc] sm:$0xf0]  ;;  %v1489_v14 = vld [vmem:[#allocation5 + $0x1c0] sm:$0xf] }
  0x1b   :  { %v1510_v12 = vor.u32 %v1739_v9, %v1507_v10  ;;  %v1737_v15 = vld [vmem:[#allocation5 + $0x1cc] sm:$0xf0]  ;;  %501 = vmatpush.bf16.msra.mxu1 %v1506_v7  ;;  %v1362_v16 = vor.u32 %v1705_v13, %v1361_v11  ;;  %v1703_v18 = vld [vmem:[#allocation5 + $0xc4] sm:$0xf]  ;;  %v1363_v19 = vld [vmem:[#allocation5 + $0xd0] sm:$0xf0] }
  0x1c   :  { %515 = vmatpush.bf16.msra.mxu2 %v1382_v8  ;;  %v1490_v17 = vor.u32 %v1737_v15, %v1489_v14  ;;  %v1735_v20 = vld [vmem:[#allocation5 + $0x1c4] sm:$0xf]  ;;  %v1366_v21 = vor.u32 %v1703_v18, %v1363_v19  ;;  %v1491_v22 = vld [vmem:[#allocation5 + $0x1d0] sm:$0xf0]  ;;  %v1345_v23 = vld [vmem:[#allocation5 + $0xa0] sm:$0xf] }
  0x1d   :  { %529 = vmatpush.bf16.msra.mxu3 %v1510_v12  ;;  %v1701_v24 = vld [vmem:[#allocation5 + $0xac] sm:$0xf0]  ;;  %v1494_v25 = vor.u32 %v1735_v20, %v1491_v22  ;;  %v1473_v26 = vld [vmem:[#allocation5 + $0x1a0] sm:$0xf]  ;;  %v1699_v28 = vld [vmem:[#allocation5 + $0xa4] sm:$0xf] }
  0x1e   :  { %v1733_v27 = vld [vmem:[#allocation5 + $0x1ac] sm:$0xf0]  ;;  %488 = vmatpush.bf16.msra.mxu0 %v1362_v16  ;;  %v1346_v29 = vor.u32 %v1701_v24, %v1345_v23  ;;  %v1347_v30 = vld [vmem:[#allocation5 + $0xb0] sm:$0xf0]  ;;  %v1731_v31 = vld [vmem:[#allocation5 + $0x1a4] sm:$0xf] }
  0x1f   :  { %v1475_v32 = vld [vmem:[#allocation5 + $0x1b0] sm:$0xf0]  ;;  %502 = vmatpush.bf16.msra.mxu1 %v1490_v17  ;;  %v1474_v33 = vor.u32 %v1733_v27, %v1473_v26  ;;  %v1350_v34 = vor.u32 %v1699_v28, %v1347_v30  ;;  %v1329_v35 = vld [vmem:[#allocation5 + $0x80] sm:$0xf]  ;;  %v1697_v36 = vld [vmem:[#allocation5 + $0x8c] sm:$0xf0] }
  0x20   :  { %516 = vmatpush.bf16.msra.mxu2 %v1366_v21  ;;  %v1457_v37 = vld [vmem:[#allocation5 + $0x180] sm:$0xf]  ;;  %v1478_v38 = vor.u32 %v1731_v31, %v1475_v32  ;;  %v1729_v39 = vld [vmem:[#allocation5 + $0x18c] sm:$0xf0]  ;;  %v1695_v40 = vld [vmem:[#allocation5 + $0x84] sm:$0xf]  ;;  %v1330_v44 = vor.u32 %v1697_v36, %v1329_v35 }
  0x21   :  { %530 = vmatpush.bf16.msra.mxu3 %v1494_v25  ;;  %v1331_v41 = vld [vmem:[#allocation5 + $0x90] sm:$0xf0]  ;;  %v1727_v42 = vld [vmem:[#allocation5 + $0x184] sm:$0xf]  ;;  %v1458_v45 = vor.u32 %v1729_v39, %v1457_v37  ;;  %v1313_v47 = vld [vmem:[#allocation5 + $0x60] sm:$0xf] }
  0x22   :  { %v1459_v43 = vld [vmem:[#allocation5 + $0x190] sm:$0xf0]  ;;  %489 = vmatpush.bf16.msra.mxu0 %v1346_v29  ;;  %v1334_v46 = vor.u32 %v1695_v40, %v1331_v41  ;;  %v1693_v48 = vld [vmem:[#allocation5 + $0x6c] sm:$0xf0]  ;;  %v1441_v49 = vld [vmem:[#allocation5 + $0x160] sm:$0xf] }
  0x23   :  { %503 = vmatpush.bf16.msra.mxu1 %v1474_v33  ;;  %v1462_v50 = vor.u32 %v1727_v42, %v1459_v43  ;;  %v1725_v51 = vld [vmem:[#allocation5 + $0x16c] sm:$0xf0]  ;;  %v1691_v52 = vld [vmem:[#allocation5 + $0x64] sm:$0xf]  ;;  %v1315_v53 = vld [vmem:[#allocation5 + $0x70] sm:$0xf0]  ;;  %v1314_v56 = vor.u32 %v1693_v48, %v1313_v47 }
  0x24   :  { %517 = vmatpush.bf16.msra.mxu2 %v1350_v34  ;;  %v1723_v54 = vld [vmem:[#allocation5 + $0x164] sm:$0xf]  ;;  %v1443_v55 = vld [vmem:[#allocation5 + $0x170] sm:$0xf0]  ;;  %v1442_v57 = vor.u32 %v1725_v51, %v1441_v49  ;;  %v1318_v58 = vor.u32 %v1691_v52, %v1315_v53  ;;  %v1297_v59 = vld [vmem:[#allocation5 + $0x40] sm:$0xf] }
  0x25   :  { %531 = vmatpush.bf16.msra.mxu3 %v1478_v38  ;;  %v1689_v60 = vld [vmem:[#allocation5 + $0x4c] sm:$0xf0]  ;;  %v1425_v61 = vld [vmem:[#allocation5 + $0x140] sm:$0xf]  ;;  %v1446_v62 = vor.u32 %v1723_v54, %v1443_v55  ;;  %v1687_v0 = vld [vmem:[#allocation5 + $0x44] sm:$0xf] }
  0x26   :  { %490 = vmatpush.bf16.msra.mxu0 %v1330_v44  ;;  %v1721_v63 = vld [vmem:[#allocation5 + $0x14c] sm:$0xf0]  ;;  %v1299_v1 = vld [vmem:[#allocation5 + $0x50] sm:$0xf0]  ;;  %v1719_v2 = vld [vmem:[#allocation5 + $0x144] sm:$0xf]  ;;  %v1298_v4 = vor.u32 %v1689_v60, %v1297_v59 }
  0x27   :  { %504 = vmatpush.bf16.msra.mxu1 %v1458_v45  ;;  %v1427_v3 = vld [vmem:[#allocation5 + $0x150] sm:$0xf0]  ;;  %v1426_v5 = vor.u32 %v1721_v63, %v1425_v61  ;;  %v1302_v6 = vor.u32 %v1687_v0, %v1299_v1  ;;  %v1281_v7 = vld [vmem:[#allocation5 + $0x20] sm:$0xf]  ;;  %v1685_v8 = vld [vmem:[#allocation5 + $0x2c] sm:$0xf0] }
  0x28   :  { %518 = vmatpush.bf16.msra.mxu2 %v1334_v46  ;;  %v1409_v9 = vld [vmem:[#allocation5 + $0x120] sm:$0xf]  ;;  %v1430_v10 = vor.u32 %v1719_v2, %v1427_v3  ;;  %v1717_v11 = vld [vmem:[#allocation5 + $0x12c] sm:$0xf0]  ;;  %v1683_v12 = vld [vmem:[#allocation5 + $0x24] sm:$0xf]  ;;  %v1282_v16 = vor.u32 %v1685_v8, %v1281_v7 }
  0x29   :  { %532 = vmatpush.bf16.msra.mxu3 %v1462_v50  ;;  %v1283_v13 = vld [vmem:[#allocation5 + $0x30] sm:$0xf0]  ;;  %v1715_v14 = vld [vmem:[#allocation5 + $0x124] sm:$0xf]  ;;  %v1265_v17 = vld [vmem:[#allocation5] sm:$0xf]  ;;  %v1410_v20 = vor.u32 %v1717_v11, %v1409_v9 }
  0x2a   :  { %491 = vmatpush.bf16.msra.mxu0 %v1314_v56  ;;  %v1411_v15 = vld [vmem:[#allocation5 + $0x130] sm:$0xf0]  ;;  %v1681_v18 = vld [vmem:[#allocation5 + $0xc] sm:$0xf0]  ;;  %v1393_v19 = vld [vmem:[#allocation5 + $0x100] sm:$0xf]  ;;  %v1286_v21 = vor.u32 %v1683_v12, %v1283_v13 }
  0x2b   :  { %505 = vmatpush.bf16.msra.mxu1 %v1442_v57  ;;  %v1713_v22 = vld [vmem:[#allocation5 + $0x10c] sm:$0xf0]  ;;  %v1679_v23 = vld [vmem:[#allocation5 + $0x4] sm:$0xf]  ;;  %v1267_v24 = vld [vmem:[#allocation5 + $0x10] sm:$0xf0]  ;;  %v1414_v25 = vor.u32 %v1715_v14, %v1411_v15  ;;  %v1266_v32 = vor.u32 %v1681_v18, %v1265_v17 }
  0x2c   :  { %519 = vmatpush.bf16.msra.mxu2 %v1318_v58  ;;  %v1711_v26 = vld [vmem:[#allocation5 + $0x104] sm:$0xf]  ;;  %v1395_v27 = vld [vmem:[#allocation5 + $0x110] sm:$0xf0]  ;;  %v1385_v28 = vld [vmem:[#allocation5 + $0xe8] sm:$0xf]  ;;  %v1394_v36 = vor.u32 %v1713_v22, %v1393_v19  ;;  %v1270_v37 = vor.u32 %v1679_v23, %v1267_v24 }
  0x2d   :  { %533 = vmatpush.bf16.msra.mxu3 %v1446_v62  ;;  %v1710_v29 = vld [vmem:[#allocation5 + $0xf4] sm:$0xf0]  ;;  %v1513_v30 = vld [vmem:[#allocation5 + $0x1e8] sm:$0xf]  ;;  %v1708_v33 = vld [vmem:[#allocation5 + $0xec] sm:$0xf]  ;;  %v1398_v41 = vor.u32 %v1711_v26, %v1395_v27 }
  0x2e   :  { %492 = vmatpush.bf16.msra.mxu0 %v1298_v4  ;;  %v1742_v31 = vld [vmem:[#allocation5 + $0x1f4] sm:$0xf0]  ;;  %v1387_v34 = vld [vmem:[#allocation5 + $0xf8] sm:$0xf0]  ;;  %v1740_v35 = vld [vmem:[#allocation5 + $0x1ec] sm:$0xf]  ;;  %v1386_v42 = vor.u32 %v1710_v29, %v1385_v28 }
  0x2f   :  { %506 = vmatpush.bf16.msra.mxu1 %v1426_v5  ;;  %v1515_v38 = vld [vmem:[#allocation5 + $0x1f8] sm:$0xf0]  ;;  %v97_v39 = vld [vmem:[#allocation2] sm:$0xff]  ;;  %v99_v40 = vld [vmem:[#allocation2 + $0x10] sm:$0xff]  ;;  %v1514_v45 = vor.u32 %v1742_v31, %v1513_v30  ;;  %v1390_v46 = vor.u32 %v1708_v33, %v1387_v34  ;;  %s1968_s2 = smov [#allocation11]   ;;  %s1248_s21 = sshll.u32 %s2081_s5, 4  ;;  %s1249_s21 = int_to_ptr.hbm [resolvable:$true] %s1248_s21 }
  0x30   :  { %520 = vmatpush.bf16.msra.mxu2 %v1302_v6  ;;  %v98_v43 = vld [vmem:[#allocation2 + $0x8] sm:$0xff]  ;;  %v100_v44 = vld [vmem:[#allocation2 + $0x18] sm:$0xff]  ;;  %v1518_v50 = vor.u32 %v1740_v35, %v1515_v38  ;;  %v2016_v51 = vpack.c.bf16 %v99_v40, %v97_v39  ;;  %s1246_s4 = sshll.u32 %s1968_s2, 4  ;;  %s1969_s22 = smov 128   ;;  %s1247_s4 = int_to_ptr.vmem [resolvable:$true] %s1246_s4 }
  0x31   :  { %534 = vmatpush.bf16.msra.mxu3 %v1430_v10  ;;  %v1369_v47 = vld [vmem:[#allocation5 + $0xc8] sm:$0xf]  ;;  %v1706_v48 = vld [vmem:[#allocation5 + $0xd4] sm:$0xf0]  ;;  %v1704_v53 = vld [vmem:[#allocation5 + $0xcc] sm:$0xf]  ;;  %v2018_v55 = vpack.c.bf16 %v100_v44, %v98_v43 }
  0x32   :  { %493 = vmatpush.bf16.msra.mxu0 %v1282_v16  ;;  %v1497_v49 = vld [vmem:[#allocation5 + $0x1c8] sm:$0xf]  ;;  %v1738_v52 = vld [vmem:[#allocation5 + $0x1d4] sm:$0xf0]  ;;  %v1371_v54 = vld [vmem:[#allocation5 + $0xd8] sm:$0xf0]  ;;  %v1370_v58 = vor.u32 %v1706_v48, %v1369_v47 }
  0x33   :  { %507 = vmatpush.bf16.msra.mxu1 %v1410_v20  ;;  %v1736_v56 = vld [vmem:[#allocation5 + $0x1cc] sm:$0xf]  ;;  %v1499_v57 = vld [vmem:[#allocation5 + $0x1d8] sm:$0xf0]  ;;  %v1498_v59 = vor.u32 %v1738_v52, %v1497_v49  ;;  %v1374_v60 = vor.u32 %v1704_v53, %v1371_v54  ;;  %v1353_v61 = vld [vmem:[#allocation5 + $0xa8] sm:$0xf] }
  0x34   :  { %521 = vmatpush.bf16.msra.mxu2 %v1286_v21  ;;  %v1702_v62 = vld [vmem:[#allocation5 + $0xb4] sm:$0xf0]  ;;  %v1481_v63 = vld [vmem:[#allocation5 + $0x1a8] sm:$0xf]  ;;  %v1502_v0 = vor.u32 %v1736_v56, %v1499_v57  ;;  %v1700_v2 = vld [vmem:[#allocation5 + $0xac] sm:$0xf] }
  0x35   :  { %535 = vmatpush.bf16.msra.mxu3 %v1414_v25  ;;  %v1734_v1 = vld [vmem:[#allocation5 + $0x1b4] sm:$0xf0]  ;;  %v1355_v3 = vld [vmem:[#allocation5 + $0xb8] sm:$0xf0]  ;;  %v1732_v4 = vld [vmem:[#allocation5 + $0x1ac] sm:$0xf]  ;;  %v1354_v6 = vor.u32 %v1702_v62, %v1353_v61 }
  0x36   :  { %494 = vmatpush.bf16.msra.mxu0 %v1266_v32  ;;  %v1483_v5 = vld [vmem:[#allocation5 + $0x1b8] sm:$0xf0]  ;;  %v1482_v7 = vor.u32 %v1734_v1, %v1481_v63  ;;  %v1358_v8 = vor.u32 %v1700_v2, %v1355_v3  ;;  %v1337_v9 = vld [vmem:[#allocation5 + $0x88] sm:$0xf]  ;;  %v1698_v10 = vld [vmem:[#allocation5 + $0x94] sm:$0xf0] }
  0x37   :  { %508 = vmatpush.bf16.msra.mxu1 %v1394_v36  ;;  %v1465_v11 = vld [vmem:[#allocation5 + $0x188] sm:$0xf]  ;;  %v1486_v12 = vor.u32 %v1732_v4, %v1483_v5  ;;  %v1730_v13 = vld [vmem:[#allocation5 + $0x194] sm:$0xf0]  ;;  %v1696_v14 = vld [vmem:[#allocation5 + $0x8c] sm:$0xf]  ;;  %v1338_v18 = vor.u32 %v1698_v10, %v1337_v9 }
  0x38   :  { %522 = vmatpush.bf16.msra.mxu2 %v1270_v37  ;;  %v1339_v15 = vld [vmem:[#allocation5 + $0x98] sm:$0xf0]  ;;  %v1728_v16 = vld [vmem:[#allocation5 + $0x18c] sm:$0xf]  ;;  %v1466_v19 = vor.u32 %v1730_v13, %v1465_v11  ;;  %v1321_v21 = vld [vmem:[#allocation5 + $0x68] sm:$0xf] }
  0x39   :  { %536 = vmatpush.bf16.msra.mxu3 %v1398_v41  ;;  %495 = vmatmul.bf16.vlgmr.msra.gmra.mxu0 %v2016_v51  ;;  %v1467_v17 = vld [vmem:[#allocation5 + $0x198] sm:$0xf0]  ;;  %v1342_v20 = vor.u32 %v1696_v14, %v1339_v15  ;;  %v1694_v22 = vld [vmem:[#allocation5 + $0x74] sm:$0xf0]  ;;  %v1449_v23 = vld [vmem:[#allocation5 + $0x168] sm:$0xf] }
  0x3a   :  { %543 = vmatpush.bf16.msrb.mxu0 %v1386_v42  ;;  %509 = vmatmul.bf16.vlgmr.msra.gmra.mxu1 %v2018_v55  ;;  %v1470_v24 = vor.u32 %v1728_v16, %v1467_v17  ;;  %v1726_v25 = vld [vmem:[#allocation5 + $0x174] sm:$0xf0]  ;;  %v1692_v26 = vld [vmem:[#allocation5 + $0x6c] sm:$0xf]  ;;  %v1323_v27 = vld [vmem:[#allocation5 + $0x78] sm:$0xf0]  ;;  %v1322_v30 = vor.u32 %v1694_v22, %v1321_v21 }
  0x3b   :  { %557 = vmatpush.bf16.msrb.mxu1 %v1514_v45  ;;  %523 = vmatmul.bf16.vlgmr.msra.gmra.mxu2 %v2016_v51  ;;  %v1724_v28 = vld [vmem:[#allocation5 + $0x16c] sm:$0xf]  ;;  %v1451_v29 = vld [vmem:[#allocation5 + $0x178] sm:$0xf0]  ;;  %v1450_v31 = vor.u32 %v1726_v25, %v1449_v23  ;;  %v1326_v32 = vor.u32 %v1692_v26, %v1323_v27  ;;  %v1305_v33 = vld [vmem:[#allocation5 + $0x48] sm:$0xf] }
  0x3c   :  { %571 = vmatpush.bf16.msrb.mxu2 %v1390_v46  ;;  %537 = vmatmul.bf16.vlgmr.msra.gmra.mxu3 %v2018_v55  ;;  %v1690_v34 = vld [vmem:[#allocation5 + $0x54] sm:$0xf0]  ;;  %v1433_v35 = vld [vmem:[#allocation5 + $0x148] sm:$0xf]  ;;  %v1454_v36 = vor.u32 %v1724_v28, %v1451_v29  ;;  %v1688_v38 = vld [vmem:[#allocation5 + $0x4c] sm:$0xf] }
  0x3d   :  { %585 = vmatpush.bf16.msrb.mxu3 %v1518_v50  ;;  %v1722_v37 = vld [vmem:[#allocation5 + $0x154] sm:$0xf0]  ;;  %v1307_v39 = vld [vmem:[#allocation5 + $0x58] sm:$0xf0]  ;;  %v1720_v40 = vld [vmem:[#allocation5 + $0x14c] sm:$0xf]  ;;  %v1306_v42 = vor.u32 %v1690_v34, %v1305_v33 }
  0x3e   :  { %544 = vmatpush.bf16.msrb.mxu0 %v1370_v58  ;;  %v1435_v41 = vld [vmem:[#allocation5 + $0x158] sm:$0xf0]  ;;  %v1434_v43 = vor.u32 %v1722_v37, %v1433_v35  ;;  %v1310_v44 = vor.u32 %v1688_v38, %v1307_v39  ;;  %v1289_v45 = vld [vmem:[#allocation5 + $0x28] sm:$0xf]  ;;  %v1686_v46 = vld [vmem:[#allocation5 + $0x34] sm:$0xf0] }
  0x3f   :  { %558 = vmatpush.bf16.msrb.mxu1 %v1498_v59  ;;  %v1417_v47 = vld [vmem:[#allocation5 + $0x128] sm:$0xf]  ;;  %v1438_v48 = vor.u32 %v1720_v40, %v1435_v41  ;;  %v1718_v49 = vld [vmem:[#allocation5 + $0x134] sm:$0xf0]  ;;  %v1684_v50 = vld [vmem:[#allocation5 + $0x2c] sm:$0xf]  ;;  %v1290_v56 = vor.u32 %v1686_v46, %v1289_v45 }
  0x40   :  { %572 = vmatpush.bf16.msrb.mxu2 %v1374_v60  ;;  %v1291_v52 = vld [vmem:[#allocation5 + $0x38] sm:$0xf0]  ;;  %v1716_v53 = vld [vmem:[#allocation5 + $0x12c] sm:$0xf]  ;;  %v1418_v57 = vor.u32 %v1718_v49, %v1417_v47  ;;  %v1273_v59 = vld [vmem:[#allocation5 + $0x8] sm:$0xf] }
  0x41   :  { %586 = vmatpush.bf16.msrb.mxu3 %v1502_v0  ;;  %v1419_v54 = vld [vmem:[#allocation5 + $0x138] sm:$0xf0]  ;;  %v1294_v58 = vor.u32 %v1684_v50, %v1291_v52  ;;  %v1682_v60 = vld [vmem:[#allocation5 + $0x14] sm:$0xf0]  ;;  %v1401_v61 = vld [vmem:[#allocation5 + $0x108] sm:$0xf] }
  0x42   :  { %545 = vmatpush.bf16.msrb.mxu0 %v1354_v6  ;;  %v1422_v62 = vor.u32 %v1716_v53, %v1419_v54  ;;  %v1714_v63 = vld [vmem:[#allocation5 + $0x114] sm:$0xf0]  ;;  %v1680_v0 = vld [vmem:[#allocation5 + $0xc] sm:$0xf]  ;;  %v1275_v1 = vld [vmem:[#allocation5 + $0x18] sm:$0xf0]  ;;  %v1274_v4 = vor.u32 %v1682_v60, %v1273_v59 }
  0x43   :  { %559 = vmatpush.bf16.msrb.mxu1 %v1482_v7  ;;  %v1712_v2 = vld [vmem:[#allocation5 + $0x10c] sm:$0xf]  ;;  %v1403_v3 = vld [vmem:[#allocation5 + $0x118] sm:$0xf0]  ;;  %v1402_v5 = vor.u32 %v1714_v63, %v1401_v61  ;;  %v1278_v6 = vor.u32 %v1680_v0, %v1275_v1  ;;  %v1749_v26 = vld [vmem:[#allocation7 + $0x30] sm:$0xff]  ;;  %s1970_s23 = smov 8  }
  0x44   :  { %573 = vmatpush.bf16.msrb.mxu2 %v1358_v8  ;;  %v1406_v7 = vor.u32 %v1712_v2, %v1403_v3  ;;  %v1750_v23 = vld [vmem:[#allocation7 + $0x38] sm:$0xff]  ;;  %v1757_v35 = vld [vmem:[#allocation7 + $0x70] sm:$0xff]  ;;  %v1747_v40 = vld [vmem:[#allocation7 + $0x20] sm:$0xff] }
  0x45   :  { %587 = vmatpush.bf16.msrb.mxu3 %v1486_v12  ;;  %v1758_v29 = vld [vmem:[#allocation7 + $0x78] sm:$0xff]  ;;  %v1756_v45 = vld [vmem:[#allocation7 + $0x68] sm:$0xff]  ;;  %v1755_v53 = vld [vmem:[#allocation7 + $0x60] sm:$0xff] }
  0x46   :  { %546 = vmatpush.bf16.msrb.mxu0 %v1338_v18  ;;  %v1745_v61 = vld [vmem:[#allocation7 + $0x10] sm:$0xff]  ;;  %v1754_v3 = vld [vmem:[#allocation7 + $0x58] sm:$0xff] }
  0x47   :  { %560 = vmatpush.bf16.msrb.mxu1 %v1466_v19 }
  0x48   :  { %574 = vmatpush.bf16.msrb.mxu2 %v1342_v20 }
  0x49   :  { %588 = vmatpush.bf16.msrb.mxu3 %v1470_v24 }
  0x4a   :  { %547 = vmatpush.bf16.msrb.mxu0 %v1322_v30 }
  0x4b   :  { %561 = vmatpush.bf16.msrb.mxu1 %v1450_v31 }
  0x4c   :  { %575 = vmatpush.bf16.msrb.mxu2 %v1326_v32  ;;  %v1748_v32 = vld [vmem:[#allocation7 + $0x28] sm:$0xff] }
  0x4d   :  { %589 = vmatpush.bf16.msrb.mxu3 %v1454_v36 }
  0x4e   :  { %548 = vmatpush.bf16.msrb.mxu0 %v1306_v42 }
  0x4f   :  { %562 = vmatpush.bf16.msrb.mxu1 %v1434_v43 }
  0x50   :  { %576 = vmatpush.bf16.msrb.mxu2 %v1310_v44 }
  0x51   :  { %590 = vmatpush.bf16.msrb.mxu3 %v1438_v48  ;;  %v1746_v48 = vld [vmem:[#allocation7 + $0x18] sm:$0xff] }
  0x52   :  { %549 = vmatpush.bf16.msrb.mxu0 %v1290_v56 }
  0x53   :  { %563 = vmatpush.bf16.msrb.mxu1 %v1418_v57 }
  0x54   :  { %577 = vmatpush.bf16.msrb.mxu2 %v1294_v58 }
  0x55   :  { %591 = vmatpush.bf16.msrb.mxu3 %v1422_v62 }
  0x56   :  { %550 = vmatpush.bf16.msrb.mxu0 %v1274_v4 }
  0x57   :  { %564 = vmatpush.bf16.msrb.mxu1 %v1402_v5 }
  0x58   :  { %578 = vmatpush.bf16.msrb.mxu2 %v1278_v6 }
  0x59   :  { %592 = vmatpush.bf16.msrb.mxu3 %v1406_v7  ;;  %551 = vmatmul.bf16.vlgmr.msrb.gmra.mxu0 %v2016_v51  ;;  %v1744_v7 = vld [vmem:[#allocation7 + $0x8] sm:$0xff] }
  0x5a   :  { %565 = vmatmul.bf16.vlgmr.msrb.gmra.mxu1 %v2018_v55  ;;  %1023 = vmatpush.bf16.msra.mxu0 %v1750_v23 }
  0x5b   :  { %579 = vmatmul.bf16.vlgmr.msrb.gmra.mxu2 %v2016_v51  ;;  %1037 = vmatpush.bf16.msra.mxu1 %v1758_v29 }
  0x5c   :  { %593 = vmatmul.bf16.vlgmr.msrb.gmra.mxu3 %v2018_v55 }
  0x5e   :  { %1024 = vmatpush.bf16.msra.mxu0 %v1749_v26 }
  0x5f   :  { %1038 = vmatpush.bf16.msra.mxu1 %v1757_v35 }
  0x62   :  { %1025 = vmatpush.bf16.msra.mxu0 %v1748_v32 }
  0x63   :  { %1039 = vmatpush.bf16.msra.mxu1 %v1756_v45 }
  0x66   :  { %1026 = vmatpush.bf16.msra.mxu0 %v1747_v40 }
  0x67   :  { %1040 = vmatpush.bf16.msra.mxu1 %v1755_v53 }
  0x6a   :  { %1027 = vmatpush.bf16.msra.mxu0 %v1746_v48 }
  0x6b   :  { %1041 = vmatpush.bf16.msra.mxu1 %v1754_v3 }
  0x6e   :  { %1028 = vmatpush.bf16.msra.mxu0 %v1745_v61 }
  0x72   :  { %1029 = vmatpush.bf16.msra.mxu0 %v1744_v7 }
  0xb6   :  { %v496_v8 = vpop.f32.mrf.mxu0 }
  0xb7   :  { %v510_v9 = vpop.f32.mrf.mxu1 }
  0xb8   :  { %v511_v11 = vadd.f32 %v510_v9, %v496_v8 }
  0xbe   :  { %v524_v10 = vpop.f32.mrf.mxu2  ;;  %v498_v13 = vpop.f32.mrf.mxu0 }
  0xbf   :  { %v538_v12 = vpop.f32.mrf.mxu3  ;;  %v512_v14 = vpop.f32.mrf.mxu1 }
  0xc0   :  { %v513_v15 = vadd.f32 %v512_v14, %v498_v13  ;;  %v539_v18 = vadd.f32 %v538_v12, %v524_v10 }
  0xc2   :  { %v599_v16 = vadd.f32 %v513_v15, %v511_v11 }
  0xc4   :  { %v600_v17 = vrot.slane %v599_v16, 4 }
  0xc6   :  { %v526_v19 = vpop.f32.mrf.mxu2  ;;  %v601_v20 = vadd.f32 %v600_v17, %v599_v16  ;;  %v1743_v17 = vld [vmem:[#allocation7] sm:$0xff] }
  0xc7   :  { %v540_v21 = vpop.f32.mrf.mxu3  ;;  %1030 = vmatpush.bf16.msra.mxu0 %v1743_v17  ;;  %v1770_v17 = vld [vmem:[#allocation7 + $0xd8] sm:$0xff] }
  0xc8   :  { %v541_v22 = vadd.f32 %v540_v21, %v526_v19  ;;  %v602_v24 = vrot.slane %v601_v20, 2  ;;  %v1766_v21 = vld [vmem:[#allocation7 + $0xb8] sm:$0xff] }
  0xc9   :  { %1051 = vmatpush.bf16.msra.mxu2 %v1766_v21 }
  0xca   :  { %v606_v51 = vadd.f32 %v541_v22, %v539_v18  ;;  %v603_v55 = vadd.f32 %v602_v24, %v601_v20  ;;  %v1752_v24 = vld [vmem:[#allocation7 + $0x48] sm:$0xff] }
  0xcc   :  { %v607_v25 = vrot.slane %v606_v51, 4  ;;  %v604_v27 = vrot.slane %v603_v55, 1 }
  0xce   :  { %v608_v28 = vadd.f32 %v607_v25, %v606_v51  ;;  %v605_v30 = vadd.f32 %v604_v27, %v603_v55 }
  0xd0   :  { %v609_v31 = vrot.slane %v608_v28, 2  ;;  %v627_v33 = vmul.f32 0.0625, %v605_v30 }
  0xd2   :  { %v610_v34 = vadd.f32 %v609_v31, %v608_v28  ;;  %v2028_v36 = vsub.f32 %v511_v11, %v627_v33  ;;  %v2030_v37 = vsub.f32 %v513_v15, %v627_v33  ;;  %v1753_v11 = vld [vmem:[#allocation7 + $0x50] sm:$0xff]  ;;  %v1751_v31 = vld [vmem:[#allocation7 + $0x40] sm:$0xff]  ;;  %v1774_v33 = vld [vmem:[#allocation7 + $0xf8] sm:$0xff] }
  0xd3   :  { %1042 = vmatpush.bf16.msra.mxu1 %v1753_v11  ;;  %v1765_v28 = vld [vmem:[#allocation7 + $0xb0] sm:$0xff]  ;;  %1065 = vmatpush.bf16.msra.mxu3 %v1774_v33 }
  0xd4   :  { %v611_v38 = vrot.slane %v610_v34, 1  ;;  %v639_v41 = vmul.f32 %v2028_v36, %v2028_v36  ;;  %v643_v42 = vmul.f32 %v2030_v37, %v2030_v37  ;;  %1052 = vmatpush.bf16.msra.mxu2 %v1765_v28  ;;  %v1761_v11 = vld [vmem:[#allocation7 + $0x90] sm:$0xff] }
  0xd5   :  { %v1769_v28 = vld [vmem:[#allocation7 + $0xd0] sm:$0xff] }
  0xd6   :  { %v552_v39 = vpop.f32.mrf.mxu0  ;;  %v612_v44 = vadd.f32 %v611_v38, %v610_v34  ;;  %v647_v46 = vadd.f32 %v643_v42, %v639_v41 }
  0xd7   :  { %v566_v43 = vpop.f32.mrf.mxu1  ;;  %1043 = vmatpush.bf16.msra.mxu1 %v1752_v24 }
  0xd8   :  { %v628_v47 = vmul.f32 0.0625, %v612_v44  ;;  %v648_v49 = vrot.slane %v647_v46, 4  ;;  %v567_v1 = vadd.f32 %v566_v43, %v552_v39  ;;  %v1764_v39 = vld [vmem:[#allocation7 + $0xa8] sm:$0xff]  ;;  %v1773_v44 = vld [vmem:[#allocation7 + $0xf0] sm:$0xff] }
  0xd9   :  { %1053 = vmatpush.bf16.msra.mxu2 %v1764_v39  ;;  %1066 = vmatpush.bf16.msra.mxu3 %v1773_v44 }
  0xda   :  { %v2036_v50 = vsub.f32 %v539_v18, %v628_v47  ;;  %v2038_v52 = vsub.f32 %v541_v22, %v628_v47  ;;  %v649_v54 = vadd.f32 %v648_v49, %v647_v46  ;;  %v1763_v49 = vld [vmem:[#allocation7 + $0xa0] sm:$0xff] }
  0xdb   :  { %1044 = vmatpush.bf16.msra.mxu1 %v1751_v31 }
  0xdc   :  { %v640_v57 = vmul.f32 %v2036_v50, %v2036_v50  ;;  %v644_v58 = vmul.f32 %v2038_v52, %v2038_v52  ;;  %v650_v62 = vrot.slane %v649_v54, 2 }
  0xdd   :  { %1054 = vmatpush.bf16.msra.mxu2 %v1763_v49 }
  0xde   :  { %v580_v56 = vpop.f32.mrf.mxu2  ;;  %v554_v60 = vpop.f32.mrf.mxu0  ;;  %v654_v0 = vadd.f32 %v644_v58, %v640_v57  ;;  %v651_v4 = vadd.f32 %v650_v62, %v649_v54  ;;  %v1772_v58 = vld [vmem:[#allocation7 + $0xe8] sm:$0xff]  ;;  %v1762_v62 = vld [vmem:[#allocation7 + $0x98] sm:$0xff] }
  0xdf   :  { %v594_v59 = vpop.f32.mrf.mxu3  ;;  %v568_v63 = vpop.f32.mrf.mxu1  ;;  %1067 = vmatpush.bf16.msra.mxu3 %v1772_v58 }
  0xe0   :  { %v569_v2 = vadd.f32 %v568_v63, %v554_v60  ;;  %v655_v5 = vrot.slane %v654_v0, 4  ;;  %v652_v8 = vrot.slane %v651_v4, 1  ;;  %v595_v19 = vadd.f32 %v594_v59, %v580_v56 }
  0xe1   :  { %1055 = vmatpush.bf16.msra.mxu2 %v1762_v62 }
  0xe2   :  { %v613_v6 = vadd.f32 %v569_v2, %v567_v1  ;;  %v656_v9 = vadd.f32 %v655_v5, %v654_v0  ;;  %v653_v12 = vadd.f32 %v652_v8, %v651_v4  ;;  %v1771_v4 = vld [vmem:[#allocation7 + $0xe0] sm:$0xff] }
  0xe3   :  { %v679_v5 = vld [vmem:[#allocation10] sm:$0x3]  ;;  %1068 = vmatpush.bf16.msra.mxu3 %v1771_v4 }
  0xe4   :  { %v614_v10 = vrot.slane %v613_v6, 4  ;;  %v657_v14 = vrot.slane %v656_v9, 2  ;;  %v675_v18 = vmul.f32 0.0625, %v653_v12 }
  0xe5   :  { %1056 = vmatpush.bf16.msra.mxu2 %v1761_v11 }
  0xe6   :  { %v582_v13 = vpop.f32.mrf.mxu2  ;;  %v615_v15 = vadd.f32 %v614_v10, %v613_v6  ;;  %v658_v22 = vadd.f32 %v657_v14, %v656_v9  ;;  %v683_v51 = vadd.f32 1e-05, %v675_v18  ;;  %v743_v18 = vperm.slane %v679_v5, 1 }
  0xe7   :  { %v596_v16 = vpop.f32.mrf.mxu3  ;;  %1069 = vmatpush.bf16.msra.mxu3 %v1770_v17 }
  0xe8   :  { %v597_v20 = vadd.f32 %v596_v16, %v582_v13  ;;  %v616_v23 = vrot.slane %v615_v15, 2  ;;  %v659_v25 = vrot.slane %v658_v22, 1  ;;  %1795 = vrsqrt.f32 %v683_v51 }
  0xe9   :  { %vm693_vm1 = vweird.f32 %v683_v51 }
  0xea   :  { %v620_v55 = vadd.f32 %v597_v20, %v595_v19  ;;  %v617_v26 = vadd.f32 %v616_v23, %v615_v15  ;;  %v660_v29 = vadd.f32 %v659_v25, %v658_v22  ;;  %v1760_v23 = vld [vmem:[#allocation7 + $0x88] sm:$0xff] }
  0xeb   :  { %v680_v25 = vld [vmem:[#allocation10 + $0x8] sm:$0x3]  ;;  %1057 = vmatpush.bf16.msra.mxu2 %v1760_v23  ;;  %1070 = vmatpush.bf16.msra.mxu3 %v1769_v28 }
  0xec   :  { %v621_v27 = vrot.slane %v620_v55, 4  ;;  %v618_v30 = vrot.slane %v617_v26, 1  ;;  %v676_v34 = vmul.f32 0.0625, %v660_v29 }
  0xee   :  { %v622_v32 = vadd.f32 %v621_v27, %v620_v55  ;;  %v619_v35 = vadd.f32 %v618_v30, %v617_v26  ;;  %v2044_v40 = vadd.f32 1e-05, %v676_v34  ;;  %v1796_v42 = vpop.eup %1795  ;;  %v1759_v34 = vld [vmem:[#allocation7 + $0x80] sm:$0xff] }
  0xef   :  { %v688_v45 = vmul.f32 %v1796_v42, %v683_v51  ;;  %vm694_vm0 = vweird.f32 %v1796_v42  ;;  %1058 = vmatpush.bf16.msra.mxu2 %v1759_v34 }
  0xf0   :  { %v623_v38 = vrot.slane %v622_v32, 2  ;;  %v629_v41 = vmul.f32 0.0625, %v619_v35  ;;  %1797 = vrsqrt.f32 %v2044_v40  ;;  %vm695_vm2 = vmor %vm693_vm1, %vm694_vm0  ;;  %vm703_vm4 = vweird.f32 %v2044_v40 }
  0xf1   :  { %v689_v53 = vmul.f32 %v1796_v42, %v688_v45 }
  0xf2   :  { %v624_v43 = vadd.f32 %v623_v38, %v622_v32  ;;  %v2047_v46 = vsub.f32 %v567_v1, %v629_v41  ;;  %v2049_v47 = vsub.f32 %v569_v2, %v629_v41 }
  0xf3   :  { %v690_v59 = vmul.f32 0.5, %v689_v53 }
  0xf4   :  { %v625_v48 = vrot.slane %v624_v43, 1  ;;  %v641_v54 = vmul.f32 %v2047_v46, %v2047_v46  ;;  %v645_v56 = vmul.f32 %v2049_v47, %v2049_v47 }
  0xf5   :  { %v691_v0 = vsub.f32 1.5, %v690_v59 }
  0xf6   :  { %v626_v57 = vadd.f32 %v625_v48, %v624_v43  ;;  %v661_v60 = vadd.f32 %v645_v56, %v641_v54  ;;  %v1798_v63 = vpop.eup %1797  ;;  %v1767_v54 = vld [vmem:[#allocation7 + $0xc0] sm:$0xff] }
  0xf7   :  { %v698_v1 = vmul.f32 %v1798_v63, %v2044_v40  ;;  %v692_v6 = vmul.f32 %v1796_v42, %v691_v0  ;;  %vm704_vm3 = vweird.f32 %v1798_v63 }
  0xf8   :  { %v630_v61 = vmul.f32 0.0625, %v626_v57  ;;  %v662_v2 = vrot.slane %v661_v60, 4  ;;  %vm705_vm5 = vmor %vm703_vm4, %vm704_vm3 }
  0xf9   :  { %v699_v8 = vmul.f32 %v1798_v63, %v698_v1  ;;  %v696_v12 = vsel %vm695_vm2, %v1796_v42, %v692_v6  ;;  %v744_v42 = vperm.slane %v680_v25, 1  ;;  %v681_v6 = vld [vmem:[#allocation10 + $0x10] sm:$0x3] }
  0xfa   :  { %v2056_v3 = vsub.f32 %v595_v19, %v630_v61  ;;  %v2058_v7 = vsub.f32 %v597_v20, %v630_v61  ;;  %v663_v9 = vadd.f32 %v662_v2, %v661_v60  ;;  %v727_v14 = vmul.f32 %v696_v12, %v679_v5 }
  0xfb   :  { %v700_v15 = vmul.f32 0.5, %v699_v8 }
  0xfc   :  { %v642_v10 = vmul.f32 %v2056_v3, %v2056_v3  ;;  %v646_v13 = vmul.f32 %v2058_v7, %v2058_v7  ;;  %v664_v16 = vrot.slane %v663_v9, 2  ;;  %v731_v20 = vperm.slane %v727_v14, 0 }
  0xfd   :  { %v701_v21 = vsub.f32 1.5, %v700_v15  ;;  %v745_v14 = vperm.slane %v681_v6, 1 }
  0xfe   :  { %v668_v19 = vadd.f32 %v646_v13, %v642_v10  ;;  %v665_v22 = vadd.f32 %v664_v16, %v663_v9  ;;  %v735_v51 = vmul.f32 %v731_v20, %v2028_v36  ;;  %v739_v55 = vmul.f32 %v731_v20, %v2030_v37  ;;  %v1768_v37 = vld [vmem:[#allocation7 + $0xc8] sm:$0xff] }
  0xff   :  { %v702_v26 = vmul.f32 %v1798_v63, %v701_v21  ;;  %1071 = vmatpush.bf16.msra.mxu3 %v1768_v37 }
 0x100   :  { %v669_v24 = vrot.slane %v668_v19, 4  ;;  %v666_v27 = vrot.slane %v665_v22, 1  ;;  %v751_v30 = vadd.f32 %v743_v18, %v739_v55  ;;  %v747_v33 = vadd.f32 %v743_v18, %v735_v51  ;;  %v682_v18 = vld [vmem:[#allocation10 + $0x18] sm:$0x3] }
 0x101   :  { %v706_v31 = vsel %vm705_vm5, %v1798_v63, %v702_v26 }
 0x102   :  { %v670_v29 = vadd.f32 %v669_v24, %v668_v19  ;;  %v667_v32 = vadd.f32 %v666_v27, %v665_v22  ;;  %v728_v35 = vmul.f32 %v706_v31, %v680_v25  ;;  %v759_v39 = vmax.f32 %v751_v30, 0.0 }
 0x103   :  { %v755_v36 = vmax.f32 %v747_v33, 0.0  ;;  %1072 = vmatpush.bf16.msra.mxu3 %v1767_v54  ;;  %v746_v25 = vperm.slane %v682_v18, 1  ;;  %v1781_v54 = vld [vmem:[#allocation8 + $0x30] sm:$0xff] }
 0x104   :  { %v671_v38 = vrot.slane %v670_v29, 2  ;;  %v677_v40 = vmul.f32 0.0625, %v667_v32  ;;  %v732_v41 = vperm.slane %v728_v35, 0 }
 0x105   :  { %v763_v45 = vpack.c.bf16 %v759_v39, %v755_v36 }
 0x106   :  { %v672_v43 = vadd.f32 %v671_v38, %v670_v29  ;;  %v685_v44 = vadd.f32 1e-05, %v677_v40  ;;  %v736_v48 = vmul.f32 %v732_v41, %v2036_v50  ;;  %v740_v49 = vmul.f32 %v732_v41, %v2038_v52 }
 0x107   :  { %1031 = vmatmul.bf16.vlgmr.msra.gmra.mxu0 %v763_v45 }
 0x108   :  { %v673_v53 = vrot.slane %v672_v43, 1  ;;  %1799 = vrsqrt.f32 %v685_v44  ;;  %v752_v56 = vadd.f32 %v744_v42, %v740_v49  ;;  %v748_v58 = vadd.f32 %v744_v42, %v736_v48  ;;  %v1782_v48 = vld [vmem:[#allocation8 + $0x38] sm:$0xff] }
 0x109   :  { %vm713_vm7 = vweird.f32 %v685_v44  ;;  %1185 = vmatpush.bf16.msrb.mxu0 %v1782_v48 }
 0x10a   :  { %v674_v57 = vadd.f32 %v673_v53, %v672_v43  ;;  %v760_v59 = vmax.f32 %v752_v56, 0.0  ;;  %v756_v61 = vmax.f32 %v748_v58, 0.0  ;;  %v1780_v58 = vld [vmem:[#allocation8 + $0x28] sm:$0xff] }
 0x10c   :  { %v678_v60 = vmul.f32 0.0625, %v674_v57  ;;  %v764_v63 = vpack.c.bf16 %v760_v59, %v756_v61  ;;  %v1779_v61 = vld [vmem:[#allocation8 + $0x20] sm:$0xff] }
 0x10d   :  { %1186 = vmatpush.bf16.msrb.mxu0 %v1781_v54 }
 0x10e   :  { %v686_v62 = vadd.f32 1e-05, %v678_v60  ;;  %v1800_v0 = vpop.eup %1799  ;;  %1045 = vmatmul.bf16.vlgmr.msra.gmra.mxu1 %v764_v63 }
 0x10f   :  { %v708_v1 = vmul.f32 %v1800_v0, %v685_v44  ;;  %vm714_vm6 = vweird.f32 %v1800_v0 }
 0x110   :  { %1801 = vrsqrt.f32 %v686_v62  ;;  %vm715_vm8 = vmor %vm713_vm7, %vm714_vm6  ;;  %vm723_vm10 = vweird.f32 %v686_v62 }
 0x111   :  { %v709_v50 = vmul.f32 %v1800_v0, %v708_v1  ;;  %1187 = vmatpush.bf16.msrb.mxu0 %v1780_v58 }
 0x113   :  { %v710_v2 = vmul.f32 0.5, %v709_v50  ;;  %v1778_v50 = vld [vmem:[#allocation8 + $0x18] sm:$0xff] }
 0x115   :  { %v711_v4 = vsub.f32 1.5, %v710_v2  ;;  %1188 = vmatpush.bf16.msrb.mxu0 %v1779_v61  ;;  %v1219_v61 = vld [vmem:[#allocation10] sm:$0x30] }
 0x116   :  { %v1802_v52 = vpop.eup %1801 }
 0x117   :  { %v718_v5 = vmul.f32 %v1802_v52, %v686_v62  ;;  %v712_v8 = vmul.f32 %v1800_v0, %v711_v4  ;;  %vm724_vm9 = vweird.f32 %v1802_v52  ;;  %v1777_v4 = vld [vmem:[#allocation8 + $0x10] sm:$0xff] }
 0x118   :  { %vm725_vm11 = vmor %vm723_vm10, %vm724_vm9 }
 0x119   :  { %v719_v9 = vmul.f32 %v1802_v52, %v718_v5  ;;  %v716_v10 = vsel %vm715_vm8, %v1800_v0, %v712_v8  ;;  %1189 = vmatpush.bf16.msrb.mxu0 %v1778_v50  ;;  %v1776_v8 = vld [vmem:[#allocation8 + $0x8] sm:$0xff]  ;;  %v1235_v50 = vperm.slane %v1219_v61, 5 }
 0x11a   :  { %v729_v11 = vmul.f32 %v716_v10, %v681_v6 }
 0x11b   :  { %v720_v12 = vmul.f32 0.5, %v719_v9 }
 0x11c   :  { %v733_v13 = vperm.slane %v729_v11, 0  ;;  %v1775_v11 = vld [vmem:[#allocation8] sm:$0xff] }
 0x11d   :  { %v721_v15 = vsub.f32 1.5, %v720_v12  ;;  %1190 = vmatpush.bf16.msrb.mxu0 %v1777_v4 }
 0x11e   :  { %v737_v16 = vmul.f32 %v733_v13, %v2047_v46  ;;  %v741_v17 = vmul.f32 %v733_v13, %v2049_v47 }
 0x11f   :  { %v722_v19 = vmul.f32 %v1802_v52, %v721_v15 }
 0x120   :  { %v753_v20 = vadd.f32 %v745_v14, %v741_v17  ;;  %v749_v22 = vadd.f32 %v745_v14, %v737_v16 }
 0x121   :  { %v726_v21 = vsel %vm725_vm11, %v1802_v52, %v722_v19  ;;  %1191 = vmatpush.bf16.msrb.mxu0 %v1776_v8 }
 0x122   :  { %v730_v23 = vmul.f32 %v726_v21, %v682_v18  ;;  %v761_v24 = vmax.f32 %v753_v20, 0.0  ;;  %v757_v51 = vmax.f32 %v749_v22, 0.0  ;;  %v1099_v20 = vld [vmem:[#allocation10] sm:$0xc] }
 0x124   :  { %v734_v55 = vperm.slane %v730_v23, 0  ;;  %v765_v26 = vpack.c.bf16 %v761_v24, %v757_v51  ;;  %v1115_v51 = vperm.slane %v1099_v20, 3 }
 0x125   :  { %1192 = vmatpush.bf16.msrb.mxu0 %v1775_v11 }
 0x126   :  { %v738_v27 = vmul.f32 %v734_v55, %v2056_v3  ;;  %v742_v28 = vmul.f32 %v734_v55, %v2058_v7  ;;  %1059 = vmatmul.bf16.vlgmr.msra.gmra.mxu2 %v765_v26 }
 0x128   :  { %v754_v46 = vadd.f32 %v746_v25, %v742_v28  ;;  %v750_v47 = vadd.f32 %v746_v25, %v738_v27 }
 0x12a   :  { %v762_v29 = vmax.f32 %v754_v46, 0.0  ;;  %v758_v30 = vmax.f32 %v750_v47, 0.0 }
 0x12c   :  { %v766_v31 = vpack.c.bf16 %v762_v29, %v758_v30 }
 0x12e   :  { %1073 = vmatmul.bf16.vlgmr.msra.gmra.mxu3 %v766_v31 }
 0x184   :  { %v1032_v33 = vpop.f32.mrf.mxu0 }
 0x18b   :  { %v1046_v32 = vpop.f32.mrf.mxu1 }
 0x18c   :  { %v1034_v39 = vpop.f32.mrf.mxu0  ;;  %v1047_v36 = vadd.f32 %v1046_v32, %v1032_v33 }
 0x193   :  { %v1048_v38 = vpop.f32.mrf.mxu1 }
 0x194   :  { %v1049_v37 = vadd.f32 %v1048_v38, %v1034_v39 }
 0x1a9   :  { %v1060_v34 = vpop.f32.mrf.mxu2 }
 0x1aa   :  { %v1061_v41 = vadd.f32 %v1060_v34, %v1047_v36 }
 0x1b1   :  { %v1074_v35 = vpop.f32.mrf.mxu3  ;;  %v1062_v40 = vpop.f32.mrf.mxu2 }
 0x1b2   :  { %v1063_v3 = vadd.f32 %v1062_v40, %v1049_v37  ;;  %v1075_v7 = vadd.f32 %v1074_v35, %v1061_v41 }
 0x1b9   :  { %v1076_v42 = vpop.f32.mrf.mxu3 }
 0x1ba   :  { %v1077_v43 = vadd.f32 %v1076_v42, %v1063_v3 }
 0x1bc   :  { %v1079_v44 = vadd.f32 %v1077_v43, %v1075_v7 }
 0x1be   :  { %v1080_v45 = vrot.slane %v1079_v44, 4 }
 0x1c0   :  { %v1081_v49 = vadd.f32 %v1080_v45, %v1079_v44 }
 0x1c2   :  { %v1082_v53 = vrot.slane %v1081_v49, 2 }
 0x1c4   :  { %v1083_v56 = vadd.f32 %v1082_v53, %v1081_v49 }
 0x1c6   :  { %v1084_v57 = vrot.slane %v1083_v56, 1 }
 0x1c8   :  { %v1085_v59 = vadd.f32 %v1084_v57, %v1083_v56 }
 0x1ca   :  { %v1086_v60 = vmul.f32 0.0625, %v1085_v59 }
 0x1cc   :  { %v1087_v62 = vsub.f32 %v1075_v7, %v1086_v60  ;;  %v1088_v63 = vsub.f32 %v1077_v43, %v1086_v60 }
 0x1ce   :  { %v1089_v0 = vmul.f32 %v1087_v62, %v1087_v62  ;;  %v1090_v1 = vmul.f32 %v1088_v63, %v1088_v63 }
 0x1d0   :  { %v1091_v2 = vadd.f32 %v1090_v1, %v1089_v0 }
 0x1d2   :  { %v1092_v52 = vrot.slane %v1091_v2, 4 }
 0x1d4   :  { %v1093_v5 = vadd.f32 %v1092_v52, %v1091_v2 }
 0x1d6   :  { %v1094_v6 = vrot.slane %v1093_v5, 2 }
 0x1d8   :  { %v1095_v9 = vadd.f32 %v1094_v6, %v1093_v5 }
 0x1da   :  { %v1096_v10 = vrot.slane %v1095_v9, 1 }
 0x1dc   :  { %v1097_v12 = vadd.f32 %v1096_v10, %v1095_v9 }
 0x1de   :  { %v1098_v13 = vmul.f32 0.0625, %v1097_v12 }
 0x1e0   :  { %v1100_v14 = vadd.f32 1e-05, %v1098_v13 }
 0x1e2   :  { %1803 = vrsqrt.f32 %v1100_v14  ;;  %vm1107_vm13 = vweird.f32 %v1100_v14 }
 0x1e8   :  { %v1804_v15 = vpop.eup %1803 }
 0x1e9   :  { %v1102_v16 = vmul.f32 %v1804_v15, %v1100_v14  ;;  %vm1108_vm12 = vweird.f32 %v1804_v15 }
 0x1ea   :  { %vm1109_vm14 = vmor %vm1107_vm13, %vm1108_vm12 }
 0x1eb   :  { %v1103_v17 = vmul.f32 %v1804_v15, %v1102_v16 }
 0x1ed   :  { %v1104_v18 = vmul.f32 0.5, %v1103_v17 }
 0x1ef   :  { %v1105_v19 = vsub.f32 1.5, %v1104_v18 }
 0x1f1   :  { %v1106_v21 = vmul.f32 %v1804_v15, %v1105_v19 }
 0x1f3   :  { %v1110_v22 = vsel %vm1109_vm14, %v1804_v15, %v1106_v21 }
 0x1f4   :  { %v1111_v23 = vmul.f32 %v1110_v22, %v1099_v20 }
 0x1f6   :  { %v1112_v24 = vperm.slane %v1111_v23, 2 }
 0x1f8   :  { %v1113_v55 = vmul.f32 %v1112_v24, %v1087_v62  ;;  %v1114_v25 = vmul.f32 %v1112_v24, %v1088_v63 }
 0x1fa   :  { %v1117_v26 = vadd.f32 %v1115_v51, %v1114_v25  ;;  %v1116_v27 = vadd.f32 %v1115_v51, %v1113_v55 }
 0x1fc   :  { %v1119_v28 = vmax.f32 %v1117_v26, 0.0  ;;  %v1118_v46 = vmax.f32 %v1116_v27, 0.0 }
 0x1fe   :  { %v1120_v47 = vpack.c.bf16 %v1119_v28, %v1118_v46 }
 0x200   :  { %1193 = vmatmul.bf16.vlgmr.msrb.gmra.mxu0 %v1120_v47 }
 0x27d   :  { %v1194_v29 = vpop.f32.mrf.mxu0 }
 0x285   :  { %v1196_v30 = vpop.f32.mrf.mxu0 }
 0x286   :  { %v1199_v31 = vadd.f32 %v1196_v30, %v1194_v29 }
 0x288   :  { %v1200_v32 = vrot.slane %v1199_v31, 4 }
 0x28a   :  { %v1201_v33 = vadd.f32 %v1200_v32, %v1199_v31 }
 0x28c   :  { %v1202_v34 = vrot.slane %v1201_v33, 2 }
 0x28e   :  { %v1203_v35 = vadd.f32 %v1202_v34, %v1201_v33 }
 0x290   :  { %v1204_v38 = vrot.slane %v1203_v35, 1 }
 0x292   :  { %v1205_v39 = vadd.f32 %v1204_v38, %v1203_v35 }
 0x294   :  { %v1206_v40 = vmul.f32 0.0625, %v1205_v39 }
 0x296   :  { %v1207_v36 = vsub.f32 %v1194_v29, %v1206_v40  ;;  %v1208_v37 = vsub.f32 %v1196_v30, %v1206_v40 }
 0x298   :  { %v1209_v41 = vmul.f32 %v1207_v36, %v1207_v36  ;;  %v1210_v3 = vmul.f32 %v1208_v37, %v1208_v37 }
 0x29a   :  { %v1211_v42 = vadd.f32 %v1210_v3, %v1209_v41 }
 0x29c   :  { %v1212_v7 = vrot.slane %v1211_v42, 4 }
 0x29e   :  { %v1213_v43 = vadd.f32 %v1212_v7, %v1211_v42 }
 0x2a0   :  { %v1214_v44 = vrot.slane %v1213_v43, 2 }
 0x2a2   :  { %v1215_v45 = vadd.f32 %v1214_v44, %v1213_v43 }
 0x2a4   :  { %v1216_v48 = vrot.slane %v1215_v45, 1 }
 0x2a6   :  { %v1217_v49 = vadd.f32 %v1216_v48, %v1215_v45 }
 0x2a8   :  { %v1218_v53 = vmul.f32 0.0625, %v1217_v49 }
 0x2aa   :  { %v1220_v54 = vadd.f32 1e-05, %v1218_v53 }
 0x2ac   :  { %1805 = vrsqrt.f32 %v1220_v54  ;;  %vm1227_vm0 = vweird.f32 %v1220_v54 }
 0x2b2   :  { %v1806_v56 = vpop.eup %1805 }
 0x2b3   :  { %v1222_v57 = vmul.f32 %v1806_v56, %v1220_v54  ;;  %vm1228_vm15 = vweird.f32 %v1806_v56 }
 0x2b4   :  { %vm1229_vm1 = vmor %vm1227_vm0, %vm1228_vm15 }
 0x2b5   :  { %v1223_v58 = vmul.f32 %v1806_v56, %v1222_v57 }
 0x2b7   :  { %v1224_v59 = vmul.f32 0.5, %v1223_v58 }
 0x2b9   :  { %v1225_v60 = vsub.f32 1.5, %v1224_v59 }
 0x2bb   :  { %v1226_v62 = vmul.f32 %v1806_v56, %v1225_v60 }
 0x2bd   :  { %v1230_v63 = vsel %vm1229_vm1, %v1806_v56, %v1226_v62 }
 0x2be   :  { %v1231_v0 = vmul.f32 %v1230_v63, %v1219_v61 }
 0x2c0   :  { %v1232_v1 = vperm.slane %v1231_v0, 4 }
 0x2c2   :  { %v1233_v2 = vmul.f32 %v1232_v1, %v1207_v36  ;;  %v1234_v52 = vmul.f32 %v1232_v1, %v1208_v37 }
 0x2c4   :  { %v1236_v4 = vadd.f32 %v1235_v50, %v1233_v2  ;;  %v1237_v5 = vadd.f32 %v1235_v50, %v1234_v52 }
 0x2c6   :  { %v1238_v6 = vmax.f32 %v1236_v4, 0.0  ;;  %v1239_v8 = vmax.f32 %v1237_v5, 0.0 }
 0x2c8   :  { %1240 = vst [vmem:[#allocation11] sm:$0xff] %v1238_v6 }
 0x2c9   :  { %1241 = vst [vmem:[#allocation11 + $0x8] sm:$0xff] %v1239_v8 }
 0x2ca   :  { %1254 = dma.vmem_to_hbm [thread:$0]  %s1247_s4, 256, %s1249_s21, [#allocation4], %s1969_s22, %s1969_s22, %s1970_s23  }
 0x2cb   :  { %1957 = dma.done.wait [#allocation4], 256  }
 0x2cc   :  { %1958 = vsyncadd [#allocation4], 4294967040 }
 0x2cd   :  { %1259 = vsyncpa [#allocation3], 1 }
 0x2ce   :  { %1260 = vsyncpa [#allocation6], 1 }
 0x2cf   :  { %1261 = vsyncpa [#allocation9], 1 }
 0x2d0   :  { %1262 = vsyncpa [#allocation4], 1 }

</bundles_post_ra>
